<compile_context>
chip_gen: v7x
topology: tpu7x:2x2x1
jax: 0.10.0
libtpu: 0.0.40
codegen_flags: <defaults>
</compile_context>

<pallas_src>
import jax
import jax.numpy as jnp
from jax.experimental import pallas as pl
from jax.experimental.pallas import tpu as pltpu


def _make_integrate_kernel(n_parts):
    """Kernel body for `n_parts` concatenated inputs.

    Ref order: (w_1..w_n, bias, x_1..x_n, out)
      w_i:  (C_out, C_i)
      bias: (C_out, 1)        f32
      x_i:  (C_i, tn)
      out:  (C_out, tn)
    """

    def kernel(*refs):
        w_refs = refs[:n_parts]
        b_ref = refs[n_parts]
        x_refs = refs[n_parts + 1: 2 * n_parts + 1]
        o_ref = refs[-1]

        acc = jnp.dot(w_refs[0][...], x_refs[0][...],
                      preferred_element_type=jnp.float32)
        for w_r, x_r in zip(w_refs[1:], x_refs[1:]):
            acc = acc + jnp.dot(w_r[...], x_r[...],
                                preferred_element_type=jnp.float32)
        # bias (C_out, 1) broadcasts along the lane (pixel) axis; f32 add.
        o_ref[...] = (acc + b_ref[...]).astype(o_ref.dtype)

    return kernel


def integrator_forward(comps, content, weight, bias, reference=None,
                       tn=8192, compute_dtype=None):
    """Pallas implementation of Integrator.forward (1x1 conv over channel concat).

    Args:
      comps:      [B, C, H, W]            (NCHW, like PyTorch)
      content:    [B, C_content, H, W]
      reference:  [B, C_reference, H, W] or None
      weight:     [C_out, C_in]  (1x1 conv weight squeezed from [C_out, C_in, 1, 1]);
                  when reference is None only the first C + C_content columns are used.
      bias:       [C_out]
      tn:         target lane tile (pixels per block); clamped/rounded to hardware tiling.
      compute_dtype: optional dtype for activations/weights inside the kernel
                  (e.g. jnp.bfloat16 to halve HBM traffic); accumulation stays f32.
    Returns:
      [B, C_out, H, W] in comps.dtype.
    """
    parts = [comps, content] if reference is None else [comps, content, reference]
    B, _, H, W = comps.shape
    HW = H * W
    C_out = weight.shape[0]
    c_sizes = [int(p.shape[1]) for p in parts]
    c_total = sum(c_sizes)
    assert weight.shape[1] >= c_total, "weight has fewer input channels than concat"

    # Split the 1x1-conv weight per concatenated part (so no concat of activations
    # is ever materialized; also makes reference=None use only the needed columns).
    w_parts = []
    off = 0
    for c in c_sizes:
        w_parts.append(weight[:, off:off + c])
        off += c

    x_dtype = comps.dtype if compute_dtype is None else compute_dtype
    # NCHW -> [B, C_part, H*W] is a contiguous reshape (no HBM pass).
    x_parts = [p.reshape(B, c, HW).astype(x_dtype) for p, c in zip(parts, c_sizes)]
    w_parts = [w.astype(x_dtype) for w in w_parts]
    b2 = bias.reshape(C_out, 1).astype(jnp.float32)

    # Lane tile: as large as useful, multiple of 128 (or the full HW extent).
    if HW % 128 == 0:
        tn_eff = max(128, min(int(tn), HW))
        tn_eff = (tn_eff // 128) * 128
    else:
        tn_eff = HW  # full-extent lane block for awkward spatial sizes
    grid = (B, pl.cdiv(HW, tn_eff))

    in_specs = (
        [pl.BlockSpec((C_out, c), lambda b, n: (0, 0)) for c in c_sizes]        # weights
        + [pl.BlockSpec((C_out, 1), lambda b, n: (0, 0))]                        # bias
        + [pl.BlockSpec((None, c, tn_eff), lambda b, n: (b, 0, n))               # activations
           for c in c_sizes]
    )
    out_specs = pl.BlockSpec((None, C_out, tn_eff), lambda b, n: (b, 0, n))

    out = pl.pallas_call(
        _make_integrate_kernel(len(parts)),
        out_shape=jax.ShapeDtypeStruct((B, C_out, HW), comps.dtype),
        grid_spec=pltpu.PrefetchScalarGridSpec(
            num_scalar_prefetch=0,
            grid=grid,
            in_specs=in_specs,
            out_specs=out_specs,
        ),
        compiler_params=pltpu.CompilerParams(
            dimension_semantics=("parallel", "parallel")),
    )(*w_parts, b2, *x_parts)

    # [B, C_out, H*W] -> [B, C_out, H, W]: contiguous reshape, no transpose / extra pass.
    return out.reshape(B, C_out, H, W)


if __name__ == "__main__":
    # Small shapes consistent with the module.
    B, C, C_content, C_reference, Hh, Ww = 2, 4, 4, 4, 16, 16
    C_in = C + C_content + C_reference
    C_out = C

    key = jax.random.PRNGKey(0)
    k1, k2, k3, k4, k5 = jax.random.split(key, 5)

    comps = jax.random.normal(k1, (B, C, Hh, Ww), dtype=jnp.float32)
    content = jax.random.normal(k2, (B, C_content, Hh, Ww), dtype=jnp.float32)
    reference = jax.random.normal(k3, (B, C_reference, Hh, Ww), dtype=jnp.float32)

    # Deterministic parameter init (synthetic; mirrors Conv2d(C_in, C_out, 1) shapes).
    weight = jax.random.normal(k4, (C_out, C_in), dtype=jnp.float32) * 0.1
    bias = jax.random.normal(k5, (C_out,), dtype=jnp.float32) * 0.1

    out = integrator_forward(comps, content, weight, bias, reference=reference)
    out = jax.block_until_ready(out)

    # Pure-JAX reference (1x1 conv == channel matmul).
    x = jnp.concatenate([comps, content, reference], axis=1)
    ref = jnp.einsum("bchw,oc->bohw", x, weight) + bias[None, :, None, None]
    assert out.shape == (B, C_out, Hh, Ww)
    assert jnp.allclose(out, ref, atol=1e-4, rtol=1e-4)

    # reference=None branch (module built with C_reference=0 -> weight has C+C_content cols).
    w_nr = weight[:, : C + C_content]
    out2 = integrator_forward(comps, content, w_nr, bias, reference=None)
    out2 = jax.block_until_ready(out2)
    x2 = jnp.concatenate([comps, content], axis=1)
    ref2 = jnp.einsum("bchw,oc->bohw", x2, w_nr) + bias[None, :, None, None]
    assert jnp.allclose(out2, ref2, atol=1e-4, rtol=1e-4)

    print("KERNEL_OK")
</pallas_src>

<mosaic_0001>
module attributes {stable_mosaic.version = 11 : i64} {
  func.func @kernel(%arg0: i32, %arg1: i32, %arg2: memref<4x4xf32, #tpu.memory_space<vmem>>, %arg3: memref<4x4xf32, #tpu.memory_space<vmem>>, %arg4: memref<4x4xf32, #tpu.memory_space<vmem>>, %arg5: memref<4x1xf32, #tpu.memory_space<vmem>>, %arg6: memref<1x4x256xf32, #tpu.memory_space<vmem>>, %arg7: memref<1x4x256xf32, #tpu.memory_space<vmem>>, %arg8: memref<1x4x256xf32, #tpu.memory_space<vmem>>, %arg9: memref<1x4x256xf32, #tpu.memory_space<vmem>>) attributes {dimension_semantics = [#tpu.dimension_semantics<parallel>, #tpu.dimension_semantics<parallel>], iteration_bounds = array<i64: 2, 1>, scalar_prefetch = 0 : i64, scratch_operands = 0 : i64, tpu.core_type = #tpu.core_type<tc>, window_params = [{pipeline_mode = #tpu.pipeline_mode<synchronous>, transform_indices = @transform_0, window_bounds = array<i64: 4, 4>}, {pipeline_mode = #tpu.pipeline_mode<synchronous>, transform_indices = @transform_1, window_bounds = array<i64: 4, 4>}, {pipeline_mode = #tpu.pipeline_mode<synchronous>, transform_indices = @transform_2, window_bounds = array<i64: 4, 4>}, {pipeline_mode = #tpu.pipeline_mode<synchronous>, transform_indices = @transform_3, window_bounds = array<i64: 4, 1>}, {transform_indices = @transform_4, window_bounds = array<i64: 1, 4, 256>}, {transform_indices = @transform_5, window_bounds = array<i64: 1, 4, 256>}, {transform_indices = @transform_6, window_bounds = array<i64: 1, 4, 256>}, {transform_indices = @transform_7, window_bounds = array<i64: 1, 4, 256>}]} {
    %c0 = arith.constant 0 : index
    %c0_0 = arith.constant 0 : index
    %0 = vector.load %arg2[%c0, %c0_0] : memref<4x4xf32, #tpu.memory_space<vmem>>, vector<4x4xf32>
    %c0_1 = arith.constant 0 : index
    %c0_2 = arith.constant 0 : index
    %c0_3 = arith.constant 0 : index
    %1 = vector.load %arg6[%c0_1, %c0_2, %c0_3] : memref<1x4x256xf32, #tpu.memory_space<vmem>>, vector<1x4x256xf32>
    %2 = vector.shape_cast %1 : vector<1x4x256xf32> to vector<4x256xf32>
    %cst = arith.constant dense<0.000000e+00> : vector<4x256xf32>
    %3 = tpu.matmul %0, %2, %cst {dimension_numbers = #tpu.dot_dimension_numbers<[1], [0], [0], [1], [0, 0, 1, 1], [], []>} : vector<4x4xf32>, vector<4x256xf32>, vector<4x256xf32> -> vector<4x256xf32>
    %c0_4 = arith.constant 0 : index
    %c0_5 = arith.constant 0 : index
    %4 = vector.load %arg3[%c0_4, %c0_5] : memref<4x4xf32, #tpu.memory_space<vmem>>, vector<4x4xf32>
    %c0_6 = arith.constant 0 : index
    %c0_7 = arith.constant 0 : index
    %c0_8 = arith.constant 0 : index
    %5 = vector.load %arg7[%c0_6, %c0_7, %c0_8] : memref<1x4x256xf32, #tpu.memory_space<vmem>>, vector<1x4x256xf32>
    %6 = vector.shape_cast %5 : vector<1x4x256xf32> to vector<4x256xf32>
    %cst_9 = arith.constant dense<0.000000e+00> : vector<4x256xf32>
    %7 = tpu.matmul %4, %6, %cst_9 {dimension_numbers = #tpu.dot_dimension_numbers<[1], [0], [0], [1], [0, 0, 1, 1], [], []>} : vector<4x4xf32>, vector<4x256xf32>, vector<4x256xf32> -> vector<4x256xf32>
    %8 = arith.addf %3, %7 : vector<4x256xf32>
    %c0_10 = arith.constant 0 : index
    %c0_11 = arith.constant 0 : index
    %9 = vector.load %arg4[%c0_10, %c0_11] : memref<4x4xf32, #tpu.memory_space<vmem>>, vector<4x4xf32>
    %c0_12 = arith.constant 0 : index
    %c0_13 = arith.constant 0 : index
    %c0_14 = arith.constant 0 : index
    %10 = vector.load %arg8[%c0_12, %c0_13, %c0_14] : memref<1x4x256xf32, #tpu.memory_space<vmem>>, vector<1x4x256xf32>
    %11 = vector.shape_cast %10 : vector<1x4x256xf32> to vector<4x256xf32>
    %cst_15 = arith.constant dense<0.000000e+00> : vector<4x256xf32>
    %12 = tpu.matmul %9, %11, %cst_15 {dimension_numbers = #tpu.dot_dimension_numbers<[1], [0], [0], [1], [0, 0, 1, 1], [], []>} : vector<4x4xf32>, vector<4x256xf32>, vector<4x256xf32> -> vector<4x256xf32>
    %13 = arith.addf %8, %12 : vector<4x256xf32>
    %c0_16 = arith.constant 0 : index
    %c0_17 = arith.constant 0 : index
    %14 = vector.load %arg5[%c0_16, %c0_17] : memref<4x1xf32, #tpu.memory_space<vmem>>, vector<4x1xf32>
    %15 = vector.broadcast %14 : vector<4x1xf32> to vector<4x256xf32>
    %16 = arith.addf %13, %15 : vector<4x256xf32>
    %c0_18 = arith.constant 0 : index
    %c0_19 = arith.constant 0 : index
    %c0_20 = arith.constant 0 : index
    %17 = vector.load %arg9[%c0_18, %c0_19, %c0_20] : memref<1x4x256xf32, #tpu.memory_space<vmem>>, vector<1x4x256xf32>
    %18 = vector.shape_cast %17 : vector<1x4x256xf32> to vector<4x256xf32>
    %19 = vector.shape_cast %16 : vector<4x256xf32> to vector<1x4x256xf32>
    tpu.vector_store %arg9[%c0_18, %c0_19, %c0_20], %19 {strides = array<i32>} : memref<1x4x256xf32, #tpu.memory_space<vmem>>, vector<1x4x256xf32>,
    return
  }
  func.func @transform_0(%arg0: i32, %arg1: i32) -> (i32, i32) {
    %c0_i32 = arith.constant 0 : i32
    %c0_i32_0 = arith.constant 0 : i32
    %c0_i32_1 = arith.constant 0 : i32
    return %c0_i32, %c0_i32_0 : i32, i32
  }
  func.func @transform_1(%arg0: i32, %arg1: i32) -> (i32, i32) {
    %c0_i32 = arith.constant 0 : i32
    %c0_i32_0 = arith.constant 0 : i32
    %c0_i32_1 = arith.constant 0 : i32
    return %c0_i32, %c0_i32_0 : i32, i32
  }
  func.func @transform_2(%arg0: i32, %arg1: i32) -> (i32, i32) {
    %c0_i32 = arith.constant 0 : i32
    %c0_i32_0 = arith.constant 0 : i32
    %c0_i32_1 = arith.constant 0 : i32
    return %c0_i32, %c0_i32_0 : i32, i32
  }
  func.func @transform_3(%arg0: i32, %arg1: i32) -> (i32, i32) {
    %c0_i32 = arith.constant 0 : i32
    %c0_i32_0 = arith.constant 0 : i32
    %c0_i32_1 = arith.constant 0 : i32
    return %c0_i32, %c0_i32_0 : i32, i32
  }
  func.func @transform_4(%arg0: i32, %arg1: i32) -> (i32, i32, i32) {
    %c0_i32 = arith.constant 0 : i32
    %c0_i32_0 = arith.constant 0 : i32
    return %arg0, %c0_i32, %arg1 : i32, i32, i32
  }
  func.func @transform_5(%arg0: i32, %arg1: i32) -> (i32, i32, i32) {
    %c0_i32 = arith.constant 0 : i32
    %c0_i32_0 = arith.constant 0 : i32
    return %arg0, %c0_i32, %arg1 : i32, i32, i32
  }
  func.func @transform_6(%arg0: i32, %arg1: i32) -> (i32, i32, i32) {
    %c0_i32 = arith.constant 0 : i32
    %c0_i32_0 = arith.constant 0 : i32
    return %arg0, %c0_i32, %arg1 : i32, i32, i32
  }
  func.func @transform_7(%arg0: i32, %arg1: i32) -> (i32, i32, i32) {
    %c0_i32 = arith.constant 0 : i32
    %c0_i32_0 = arith.constant 0 : i32
    return %arg0, %c0_i32, %arg1 : i32, i32, i32
  }
}

</mosaic_0001>

<bundles_post_ra>
// kernel: tpu_custom_call.1
= control target key start
LH: loop header
LB: loop body
LE: loop exit
PB: predicated region body
PF: predicated region fallthrough
CT: control target
= control target key end

     0   :  { %s1533_s0 = inlined_call_operand.vmem [shape: f32[4,4], index: 0, kind: input, shape index: {}]   ;;  %s1534_s1 = inlined_call_operand.hbm [shape: f32[4,4], index: 1, kind: input, shape index: {}]   ;;  %s1535_s2 = inlined_call_operand.hbm [shape: f32[4,4], index: 2, kind: input, shape index: {}]   ;;  %s1536_s3 = inlined_call_operand.vmem [shape: f32[4,1], index: 3, kind: input, shape index: {}]   ;;  %s1537_s4 = inlined_call_operand.vmem [shape: f32[2,4,256], index: 4, kind: input, shape index: {}]   ;;  %s1538_s5 = inlined_call_operand.hbm [shape: f32[2,4,256], index: 5, kind: input, shape index: {}]   ;;  %s1539_s6 = inlined_call_operand.hbm [shape: f32[2,4,256], index: 6, kind: input, shape index: {}]   ;;  %s1540_s7 = inlined_call_operand.hbm [shape: f32[2,4,256], index: 7, kind: output, shape index: {}]  }
   0x1   :  { %1554 = sst [smem:[#allocation18_spill]] %s1534_s1 }
   0x2   :  { %12 = vsyncpa [#allocation3], 0 }
   0x3   :  { %13 = vsyncpa [#allocation6], 0 }
   0x4   :  { %14 = vsyncpa [#allocation4], 0 }
   0x5   :  { %16 = vsyncpa [#allocation4 + $0x1], 0  ;;  %s1229_s24 = smov 0   ;;  %s1231_s25 = smov 0  }
   0x6   :  { %s1233_s26 = smov 0   ;;  %s1235_s27 = smov 0  }
   0x7   :  { %s1237_s28 = smov 0   ;;  %s1239_s29 = smov 0  }
   0x8 LB: > { %1555 = sst [smem:[#allocation14_spill]] %s1168_s26  ;;  %s1260_s30 = sadd.s32 4294967295, %s1180_s29   ;;  %s1180_s29 = sphi %s1239_s29, %s22_s29   ;;  %s1176_s28 = sphi %s1237_s28, %s1591_s28   ;;  %s1172_s27 = sphi %s1235_s27, %s1590_s27   ;;  %s1168_s26 = sphi %s1233_s26, %s1586_s26   ;;  %s1164_s25 = sphi %s1231_s25, %s1589_s25   ;;  %s1160_s24 = sphi %s1229_s24, %s1588_s24  }
   0x9   : > { %1556 = sst [smem:[#allocation15_spill]] %s1180_s29  ;;  %s839_s8 = sadd.s32 4294967294, %s1180_s29  }
   0xa   : > { %p168_p0 = scmp.ne.s32.totalorder %s1164_s25, %s1160_s24  ;;  %p1541_p1 = scmp.eq.s32.totalorder %s1260_s30, 0 }
   0xb   : > { %p228_p3 = scmp.eq.s32.totalorder %s839_s8, 1  ;;  %p840_p5 = scmp.ge.s32.totalorder %s1180_s29, 1 }
   0xc   : > { %p1269_p4 = por %p1541_p1, %p168_p0  ;;  %p235_p7 = scmp.lt.s32.totalorder %s1180_s29, 3 }
   0xd   : > { %p1274_p6 = por %p228_p3, %p168_p0  ;;  %s1182_s12 = smov [#allocation2]  }
   0xe   : > { %s1557_s9 = scalar_select %p1269_p4, 1, 0 }
   0xf   : > { %s1558_s10 = scalar_select %p1274_p6, 1, 0 }
  0x10   : > { %p1279_p8 = pnand %p840_p5, %p235_p7  ;;  %s251_s13 = sshll.u32 %s1182_s12, 4  ;;  %s252_s13 = int_to_ptr.vmem [resolvable:$true] %s251_s13 }
  0x11   : > { %s34_s15 = sadd.s32 1, %s1176_s28  ;;  %s155_s16 = sadd.s32 1, %s1168_s26 }
  0x12   : > { %s1559_s11 = scalar_select %p1279_p8, 1, 0 }
  0x13   : > { %p894_p10 = pneg %p1279_p8  ;;  %p1294_p12 = scmp.ge.s32.totalorder %s34_s15, 2 }
  0x14   : > { %s1562_s1 = sld [smem:[#allocation18_spill]] }
  0x15   : > { %p1288_p11 = pnand %p894_p10, %p1541_p1 }
  0x16   : > { %s1561_s17 = scalar_select %p1294_p12, 1, 0 }
  0x17   : > { %p1549_p0 = pneg %p1288_p11 }
  0x1a   : > { %s974_s20 = scalar_lea.hbm %s1562_s1, 64 }
  0x1b   : > { %p975_p13 = scmp.ne.s32.totalorder %s1562_s1, %s974_s20  ;;  %p981_p7 = scmp.lt.u32.totalorder %s974_s20, %s1562_s1 }
  0x1d   : > { %p977_p3 = pnand %p1549_p0, %p975_p13 }
  0x1f   : > { %p978_p5 = pneg %p977_p3 }
  0x21   : > { %p983_p10 = pnand %p981_p7, %p978_p5 }
  0x23   : > { %986 = shalt.err (!%p983_p10)
}
  0x24   : > { %s987_s12 = scalar_lea.vmem %s252_s13, 64  ;;  %p995_p6 = scmp.lt.s32.totalorder %s252_s13, %s252_s13 }
  0x25   : > { %p988_p9 = scmp.ne.s32.totalorder %s252_s13, %s987_s12  ;;  %p996_p4 = scmp.lt.s32.totalorder %s987_s12, %s987_s12 }
  0x27   : > { %p990_p1 = pnand %p988_p9, %p1549_p0  ;;  %p997_p8 = por %p996_p4, %p995_p6 }
  0x29   : > { %p991_p2 = pneg %p990_p1 }
  0x2b   : > { %p998_p12 = pnand %p997_p8, %p991_p2 }
  0x2d   : > { %1001 = shalt.err (!%p998_p12)
}
  0x2e   : > { %897 = dma.hbm_to_vmem [thread:$0]  (!%p1288_p11), %s1562_s1, 64, %s252_s13, [#allocation3]  }
  0x2f   : > { %p1563_p1 = scmp.ne.s32.totalorder %s1561_s17, 0  ;;  %p162_p2 = scmp.ne.s32.totalorder %s1168_s26, %s1164_s25 }
  0x30   : > { %p163_p4 = scmp.eq.s32.totalorder %s1180_s29, 0  ;;  %p914_p6 = scmp.lt.s32.totalorder %s1180_s29, 2 }
  0x31   : > { %s1593_s15 = smov (%p1563_p1, %s34_s15), 0  ;;  %p1565_p12 = scmp.eq.s32.totalorder %s1260_s30, 1 }
  0x32   : > { %1564 = sst [smem:[#allocation16_spill]] %s1593_s15  ;;  %s150_s20 = ssub.s32 %s1176_s28, %s1593_s15 }
  0x33   : > { %p153_p8 = scmp.eq.s32.totalorder %s150_s20, 0  ;;  %p164_p9 = por %p163_p4, %p162_p2 }
  0x34   : > { %p1332_p13 = por %p1565_p12, %p162_p2  ;;  %s289_s22 = sand.u32 1, %s1180_s29  }
  0x35   : > { %s1340_s23 = scalar_select %p153_p8, %s1168_s26, %s155_s16  }
  0x36   : > { %s1566_s21 = scalar_select %p1332_p13, 1, 0 }
  0x37   : > { %1567 = sst [smem:[#allocation17_spill]] %s1340_s23  ;;  %s291_s13 = sand.u32 1, %s1168_s26  }
  0x38   : > { %s1343_s17 = sshll.u32 %s291_s13, 3  ;;  %s1545_s8 = sshll.u32 %s1176_s28, 7 }
  0x39   : > { %s1351_s19 = scalar_lea.hbm %s1538_s5, %s1545_s8  ;;  %s293_s20 = scalar_lea.vmem [#allocation7], %s1343_s17 }
  0x3a   : > { %s303_s1 = sshll.u32 %s293_s20, 4  ;;  %p1354_p3 = pnand %p914_p6, %p164_p9  ;;  %s1358_s1 = int_to_ptr.vmem [resolvable:$true] %s303_s1 }
  0x3b   : > { %s1183_s13 = smov [#allocation5]   ;;  %s1362_s12 = scalar_lea.sflag [#allocation3], %s289_s22 }
  0x3c   : > { %s1568_s16 = scalar_select %p1354_p3, 1, 0 }
  0x3d   : > { %s1360_s15 = sshll.u32 %s1183_s13, 4  ;;  %s1002_s18 = scalar_lea.hbm %s1351_s19, 128  ;;  %s263_s15 = int_to_ptr.vmem [resolvable:$true] %s1360_s15 }
  0x3e   : > { %p1003_p5 = scmp.ne.s32.totalorder %s1351_s19, %s1002_s18  ;;  %p1551_p7 = pneg %p1354_p3 }
  0x3f   : > { %s1007_s23 = scalar_lea.hbm %s1538_s5, 256  ;;  %p1008_p2 = scmp.lt.u32.totalorder %s1351_s19, %s1538_s5 }
  0x40   : > { %p1005_p10 = pnand %p1551_p7, %p1003_p5  ;;  %p1009_p4 = scmp.lt.u32.totalorder %s1007_s23, %s1002_s18 }
  0x41   : > { %p1011_p8 = scmp.lt.u32.totalorder %s1002_s18, %s1351_s19 }
  0x42   : > { %p1006_p1 = pneg %p1005_p10  ;;  %p1010_p6 = por %p1009_p4, %p1008_p2 }
  0x44   : > { %p1012_p9 = por %p1011_p8, %p1010_p6 }
  0x46   : > { %p1013_p12 = pnand %p1012_p9, %p1006_p1 }
  0x48   : > { %1016 = shalt.err (!%p1013_p12)
}
  0x49   : > { %s1017_s22 = scalar_lea.vmem %s1358_s1, 128  ;;  %s1184_s8 = smov [#allocation7]  }
  0x4a   : > { %p1018_p5 = scmp.ne.s32.totalorder %s1358_s1, %s1017_s22  ;;  %s1022_s13 = sshll.u32 %s1184_s8, 4  ;;  %s1023_s13 = int_to_ptr.vmem [resolvable:$false] %s1022_s13 }
  0x4b   : > { %s1024_s26 = scalar_lea.vmem %s1023_s13, 256  ;;  %p1025_p13 = scmp.lt.s32.totalorder %s1358_s1, %s1023_s13 }
  0x4c   : > { %p1020_p10 = pnand %p1018_p5, %p1551_p7  ;;  %p1026_p2 = scmp.lt.s32.totalorder %s1024_s26, %s1017_s22 }
  0x4e   : > { %p1021_p0 = pneg %p1020_p10  ;;  %p1027_p4 = por %p1026_p2, %p1025_p13 }
  0x50   : > { %p1028_p6 = pnand %p1027_p4, %p1021_p0 }
  0x52   : > { %1031 = shalt.err (!%p1028_p6)
}
  0x53   : > { %904 = dma.hbm_to_vmem [thread:$0]  (!%p1354_p3), %s1351_s19, 128, %s1358_s1, %s1362_s12  }
  0x54   : > { %s1032_s18 = scalar_lea.hbm %s1535_s2, 64  ;;  %p1569_p0 = pneg %p1288_p11 }
  0x55   : > { %p1033_p1 = scmp.ne.s32.totalorder %s1535_s2, %s1032_s18  ;;  %p1039_p9 = scmp.lt.u32.totalorder %s1032_s18, %s1535_s2 }
  0x57   : > { %p1035_p13 = pnand %p1033_p1, %p1569_p0 }
  0x59   : > { %p1036_p8 = pneg %p1035_p13 }
  0x5b   : > { %p1041_p12 = pnand %p1039_p9, %p1036_p8 }
  0x5d   : > { %1044 = shalt.err (!%p1041_p12)
}
  0x5e   : > { %s1045_s1 = scalar_lea.vmem %s263_s15, 64  ;;  %p1570_p10 = pmov %p1569_p0 }
  0x5f   : > { %p1046_p5 = scmp.ne.s32.totalorder %s263_s15, %s1045_s1  ;;  %p1053_p6 = scmp.lt.s32.totalorder %s263_s15, %s263_s15 }
  0x60   : > { %p1054_p7 = scmp.lt.s32.totalorder %s1045_s1, %s1045_s1 }
  0x61   : > { %p1048_p2 = pnand %p1046_p5, %p1570_p10 }
  0x62   : > { %p1055_p3 = por %p1054_p7, %p1053_p6 }
  0x63   : > { %p1049_p4 = pneg %p1048_p2 }
  0x65   : > { %p1056_p0 = pnand %p1055_p3, %p1049_p4 }
  0x67   : > { %1059 = shalt.err (!%p1056_p0)
}
  0x68   : > { %900 = dma.hbm_to_vmem [thread:$0]  (!%p1288_p11), %s1535_s2, 64, %s263_s15, [#allocation6]  }
  0x69   : > { %s1571_s29 = sshll.u32 %s1176_s28, 7  ;;  %s314_s8 = scalar_lea.vmem [#allocation8], %s1343_s17 }
  0x6a   : > { %s1416_s20 = scalar_lea.hbm %s1539_s6, %s1571_s29  ;;  %s324_s22 = sshll.u32 %s314_s8, 4  ;;  %s325_s22 = int_to_ptr.vmem [resolvable:$true] %s324_s22 }
  0x6b   : > { %s1060_s14 = scalar_lea.hbm %s1416_s20, 128  ;;  %p1572_p7 = scmp.ne.s32.totalorder %s1568_s16, 0 }
  0x6c   : > { %p1061_p3 = scmp.ne.s32.totalorder %s1416_s20, %s1060_s14  ;;  %s1065_s1 = scalar_lea.hbm %s1539_s6, 256 }
  0x6d   : > { %p1573_p1 = pneg %p1572_p7  ;;  %p1066_p11 = scmp.lt.u32.totalorder %s1416_s20, %s1539_s6 }
  0x6e   : > { %p1067_p9 = scmp.lt.u32.totalorder %s1065_s1, %s1060_s14  ;;  %p1069_p5 = scmp.lt.u32.totalorder %s1060_s14, %s1416_s20 }
  0x6f   : > { %p1063_p13 = pnand %p1061_p3, %p1573_p1 }
  0x70   : > { %p1068_p12 = por %p1067_p9, %p1066_p11 }
  0x71   : > { %p1064_p8 = pneg %p1063_p13 }
  0x72   : > { %p1070_p10 = por %p1069_p5, %p1068_p12 }
  0x74   : > { %p1071_p2 = pnand %p1070_p10, %p1064_p8 }
  0x76   : > { %1074 = shalt.err (!%p1071_p2)
}
  0x77   : > { %s1075_s17 = scalar_lea.vmem %s325_s22, 128  ;;  %p1574_p6 = pmov %p1573_p1 }
  0x78   : > { %p1076_p4 = scmp.ne.s32.totalorder %s325_s22, %s1075_s17  ;;  %s1185_s29 = smov [#allocation8]  }
  0x79   : > { %s1080_s23 = sshll.u32 %s1185_s29, 4  ;;  %s1081_s23 = int_to_ptr.vmem [resolvable:$false] %s1080_s23 }
  0x7a   : > { %p1078_p0 = pnand %p1076_p4, %p1574_p6  ;;  %s1082_s18 = scalar_lea.vmem %s1081_s23, 256 }
  0x7b   : > { %p1083_p1 = scmp.lt.s32.totalorder %s325_s22, %s1081_s23  ;;  %p1084_p13 = scmp.lt.s32.totalorder %s1082_s18, %s1075_s17 }
  0x7c   : > { %p1079_p3 = pneg %p1078_p0 }
  0x7d   : > { %p1085_p9 = por %p1084_p13, %p1083_p1 }
  0x7f   : > { %p1086_p11 = pnand %p1085_p9, %p1079_p3 }
  0x81   : > { %1089 = shalt.err (!%p1086_p11)
}
  0x82   : > { %907 = dma.hbm_to_vmem [thread:$0]  (!%p1572_p7), %s1416_s20, 128, %s325_s22, %s1362_s12  }
  0x83   : > { %p1575_p8 = scmp.ne.s32.totalorder %s1559_s11, 0 }
  0x84   : > { %p1576_p12 = scmp.eq.s32.totalorder (!%p1575_p8), %s1260_s30, 0 }
  0x85   : > { %333 = sbr.rel (%p1575_p8) target bundleno = 402 (0x192), region = 48 }
  0x8c   : > { %1143 = dma.done.wait (%p1576_p12), [#allocation3], 64   ;;  %p1577_p5 = pmov %p1576_p12 }
  0x8e   : > { %1145 = vsyncadd (%p1577_p5), [#allocation3], 4294967232  ;;  %p1578_p10 = pmov %p1577_p5 }
  0x8f   : > { %p1579_p2 = pmov %p1577_p5 }
  0x90   : > { %1147 = dma.done.wait (%p1578_p10), [#allocation6], 64  }
  0x91   : > { %1149 = vsyncadd (%p1579_p2), [#allocation6], 4294967232  ;;  %s343_s16 = sand.u32 1, %s1260_s30   ;;  %s345_s12 = sand.u32 1, %s1164_s25  }
  0x92   : > { %s1453_s11 = sshll.u32 %s345_s12, 3  ;;  %s344_s20 = scalar_lea.sflag [#allocation3], %s343_s16 }
  0x93   : > { %s347_s8 = scalar_lea.vmem [#allocation7], %s1453_s11  ;;  %p1580_p7 = scmp.ne.s32.totalorder %s1557_s9, 0 }
  0x95   : > { %1151 = dma.done.wait (%p1580_p7), %s344_s20, 256  }
  0x96   : > { %1153 = vsyncadd (%p1580_p7), %s344_s20, 4294967040  ;;  %p402_p4 = scmp.lt.s32.totalorder %s1172_s27, 1  ;;  %v1186_v0 = vmov 0.0   ;;  %v1187_v1 = vmov 0   ;;  %vm424_vm0 = vcmask 1043456   ;;  %s356_s1 = scalar_lea.vmem [#allocation8], %s1453_s11 }
  0x97   : > { %573 = vmatprep.mubr.f32.mxu0 %v1186_v0  ;;  %493 = vmatprep.mubr.f32.mxu1 %v1186_v0  ;;  %v581_v3 = vld [vmem:[%s356_s1] sm:$0xff]  ;;  %v417_v6 = vld [vmem:[%s347_s8] sm:$0xff]  ;;  %vm420_vm1 = vcmask 31744   ;;  %s875_s29 = sshll.u32 %s1172_s27, 7  ;;  %s400_s23 = scalar_lea.vmem [#allocation9], %s1453_s11 }
  0x98   : > { %s403_s30 = scalar_select %p402_p4, %s1172_s27, 1  ;;  %970 = vset.pattern.permute.xlu0 %v1187_v1  ;;  %v583_v5 = vcombine.high %v581_v3, %v581_v3  ;;  %v414_v7 = vld [vmem:[%s1533_s0] sm:$0xf]  ;;  %v419_v8 = vcombine.high %v417_v6, %v417_v6  ;;  %v580_v11 = vld [vmem:[#allocation5] sm:$0xf] }
  0x99   : > { %v664_v9 = vld [vmem:[%s1536_s3] sm:$0xf]  ;;  %s694_s18 = sshll.u32 %s400_s23, 4  ;;  %s1483_s8 = scalar_lea.hbm %s1540_s7, %s875_s29  ;;  %s1485_s18 = int_to_ptr.vmem [resolvable:$true] %s694_s18 }
  0x9a   : > { %s874_s22 = sshll.u32 %s403_s30, 3  ;;  %667 = vperm.xlu0 %970, %v664_v9   ;;  %858 = vmatprep.subr.msk.mxu1 %vm424_vm0, %v419_v8  ;;  %v416_v10 = vld [vmem:[#allocation2] sm:$0xf]  ;;  %s678_s30 = scalar_lea.sflag [#allocation4], %s345_s12 }
  0x9b   : > { %s409_s13 = scalar_lea.vmem %s1537_s4, %s874_s22  ;;  %859 = vmatpush1.msk.msra.mxu1 %vm424_vm0, %v417_v6  ;;  %s1090_s22 = scalar_lea.vmem %s1485_s18, 128 }
  0x9c   : > { %v415_v2 = vld [vmem:[%s409_s13] sm:$0xff]  ;;  %860 = vmatmul.mubr.msk.f32.vlgmr.msra.gmra.mrb[0].mxu1 %vm420_vm1, %v416_v10  ;;  %p1091_p6 = scmp.ne.s32.totalorder %s1485_s18, %s1090_s22  ;;  %p1581_p0 = scmp.ne.s32.totalorder %s1566_s21, 0 }
  0x9d   : > { %v501_v4 = vcombine.high %v415_v2, %v415_v2  ;;  %s1188_s27 = smov [#allocation9]  }
  0x9e   : > { %p1092_p3 = pnand %p1091_p6, %p1581_p0  ;;  %s1094_s11 = sshll.u32 %s1188_s27, 4  ;;  %s1095_s11 = int_to_ptr.vmem [resolvable:$false] %s1094_s11 }
  0x9f   : > { %861 = vmatprep.subr.msk.mxu0 %vm424_vm0, %v501_v4  ;;  %s1096_s14 = scalar_lea.vmem %s1095_s11, 256  ;;  %p1097_p13 = scmp.lt.s32.totalorder %s1485_s18, %s1095_s11 }
  0xa0   : > { %862 = vmatpush1.msk.msra.mxu0 %vm424_vm0, %v415_v2  ;;  %p1093_p1 = pneg %p1092_p3  ;;  %p1098_p9 = scmp.lt.s32.totalorder %s1096_s14, %s1090_s22 }
  0xa1   : > { %863 = vmatmul.mubr.msk.f32.vlgmr.msra.gmra.mrb[0].mxu0 %vm420_vm1, %v414_v7  ;;  %864 = vmatprep.subr.msk.mxu0 %vm424_vm0, %v583_v5 }
  0xa2   : > { %865 = vmatpush1.msk.msra.mxu0 %vm424_vm0, %v581_v3  ;;  %655 = vmatprep.mubr.f32.mxu0 %v1186_v0  ;;  %p1099_p11 = por %p1098_p9, %p1097_p13 }
  0xa4   : > { %p1100_p8 = pnand %p1099_p11, %p1093_p1 }
  0xa9   : > { %866 = vmatmul.mubr.msk.f32.vlgmr.msra.gmra.mrb[0].mxu0 %vm420_vm1, %v580_v11 }
 0x119   : > { %v668_v15 = vpop.permute.xlu0 %667 }
 0x16f   : > { %v495_v12 = vpop.f32.mrb[0].mxu1 }
 0x170   : > { %v497_v13 = vpop.f32.mrb[1].mxu1 }
 0x17c   : > { %v657_v14 = vpop.f32.mrb[0].mxu0 }
 0x17d   : > { %v876_v16 = vadd.f32 %v657_v14, %v495_v12  ;;  %v659_v17 = vpop.f32.mrb[1].mxu0 }
 0x17e   : > { %v877_v18 = vadd.f32 %v659_v17, %v497_v13 }
 0x17f   : > { %v670_v19 = vadd.f32 %v876_v16, %v668_v15 }
 0x180   : > { %v671_v20 = vadd.f32 %v877_v18, %v668_v15 }
 0x182   : > { %v674_v21 = vcombine.low %v670_v19, %v671_v20 }
 0x184   : > { %676 = vst [vmem:[%s400_s23] sm:$0xff] %v674_v21 }
 0x185   : > { %1103 = shalt.err (!%p1100_p8)
}
 0x186   : > { %s1104_s12 = scalar_lea.hbm %s1483_s8, 128  ;;  %s1108_s1 = scalar_lea.hbm %s1540_s7, 256 }
 0x187   : > { %p1105_p12 = scmp.ne.s32.totalorder %s1483_s8, %s1104_s12  ;;  %p1109_p2 = scmp.lt.u32.totalorder %s1483_s8, %s1540_s7 }
 0x188   : > { %p1110_p7 = scmp.lt.u32.totalorder %s1108_s1, %s1104_s12  ;;  %p1112_p6 = scmp.lt.u32.totalorder %s1104_s12, %s1483_s8 }
 0x189   : > { %p1106_p5 = pnand %p1105_p12, %p1581_p0 }
 0x18a   : > { %p1111_p4 = por %p1110_p7, %p1109_p2 }
 0x18b   : > { %p1107_p10 = pneg %p1106_p5 }
 0x18c   : > { %p1113_p3 = por %p1112_p6, %p1111_p4 }
 0x18e   : > { %p1114_p1 = pnand %p1113_p3, %p1107_p10 }
 0x190   : > { %1117 = shalt.err (!%p1114_p1)
}
 0x191   : > { %892 = dma.vmem_to_hbm [thread:$0]  (%p1581_p0), %s1485_s18, 128, %s1483_s8, %s678_s30  }
 0x192 PF: > { %s1582_s26 = sld [smem:[#allocation15_spill]]  ;;  %s706_s17 = sand.u32 1, %s1160_s24  }
 0x193   : > { %p1583_p13 = scmp.ne.s32.totalorder %s1558_s10, 0  ;;  %s707_s29 = scalar_lea.sflag [#allocation4], %s706_s17 }
 0x198   : > { %p1584_p9 = scmp.ge.s32.totalorder %s1582_s26, 2 }
 0x19a   : > { %p909_p11 = pnand %p1584_p9, %p1583_p13 }
 0x19c   : > { %1155 = dma.done.wait (!%p909_p11), %s707_s29, 128  }
 0x19d   : > { %1157 = vsyncadd (!%p909_p11), %s707_s29, 4294967168  ;;  %s22_s29 = sadd.s32 1, %s1582_s26   ;;  %s1585_s23 = sld [smem:[#allocation14_spill]] }
 0x19e   : > { %p19_p8 = scmp.ge.s32.totalorder %s22_s29, 4   ;;  %s1586_s26 = sld [smem:[#allocation17_spill]] }
 0x19f   : > { %s1587_s21 = sld [smem:[#allocation16_spill]]  ;;  %s1588_s24 = smov %s1164_s25 }
 0x1a0   : > { %s1590_s27 = smov %s1176_s28  ;;  %21 = sbr.rel (!%p19_p8) target bundleno = 8 (0x8), region = 114 }
 0x1a3   : > { %s1589_s25 = smov %s1585_s23 }
 0x1a5   : > { %s1591_s28 = smov %s1587_s21 }
 0x1a7   :  { %712 = vsyncpa [#allocation3], 1 }
 0x1a8   :  { %714 = vsyncpa [#allocation3 + $0x1], 1 }
 0x1a9   :  { %715 = vsyncpa [#allocation6], 1 }
 0x1aa   :  { %716 = vsyncpa [#allocation4], 1 }
 0x1ab   :  { %718 = vsyncpa [#allocation4 + $0x1], 1 }

</bundles_post_ra>
